<compile_context>
chip_gen: v6e
topology: v6e:2x2x1
jax: 0.10.0
libtpu: 0.0.40
codegen_flags: <defaults>
</compile_context>

<pallas_src>
import functools

import jax
import jax.numpy as jnp
from jax.experimental import pallas as pl
from jax.experimental.pallas import tpu as pltpu

GEN_WIDTH = 5
NUM_DIM_Z = 1
NUM_DIM_X = 1
LANE = 128
SUBLANE = 8
# 2048 x 128 f32 = 1 MiB per block; in+out double-buffered ~ 4 MiB, comfortably
# inside every generation's scoped-VMEM default (16 MiB on v5e, 32 MiB v6e/v7x).
MAX_TILE_ROWS = 2048

# Packed-parameter layout (flat f32[46] living in SMEM)
_W1_OFF = 0
_B1_OFF = _W1_OFF + GEN_WIDTH
_W2_OFF = _B1_OFF + GEN_WIDTH
_B2_OFF = _W2_OFF + GEN_WIDTH * GEN_WIDTH
_W3_OFF = _B2_OFF + GEN_WIDTH
_B3_OFF = _W3_OFF + GEN_WIDTH
_N_PARAMS = _B3_OFF + NUM_DIM_X  # 46

# Per-element cost of the 1->5->5->1 MLP (hint for XLA's scheduler).
_FLOPS_PER_ELEM = 2 * (GEN_WIDTH + GEN_WIDTH * GEN_WIDTH + GEN_WIDTH)  # 70
_TRANS_PER_ELEM = 2 * GEN_WIDTH                                        # 10 tanh
_BYTES_PER_ELEM = 8                                                    # f32 in + f32 out


def _round_up(x, m):
    return ((x + m - 1) // m) * m


def _gen_kernel(p_ref, z_ref, o_ref, *, compute_dtype):
    """p_ref: SMEM f32[46] scalars; z_ref/o_ref: VMEM (tile_rows, 128) f32 slabs."""
    x = z_ref[...].astype(compute_dtype)  # one vector convert (no-op for f32)
    shp = x.shape

    def w(idx):
        # Broadcast the f32 scalar first (stays a replicated-layout splat), then
        # convert that single splatted value to the compute dtype.  Avoids any
        # scalar-side bf16 ops; identical to a plain scalar multiply for f32.
        return jnp.broadcast_to(p_ref[idx], shp).astype(compute_dtype)

    # Layer 1: 1 -> 5  (broadcast FMA on the VPU + tanh on the EUP, unrolled).
    h1 = [jnp.tanh(w(_W1_OFF + j) * x + w(_B1_OFF + j)) for j in range(GEN_WIDTH)]

    # Layer 2: 5 -> 5
    h2 = []
    for k in range(GEN_WIDTH):
        acc = w(_B2_OFF + k) + w(_W2_OFF + 0 * GEN_WIDTH + k) * h1[0]
        for j in range(1, GEN_WIDTH):
            acc = acc + w(_W2_OFF + j * GEN_WIDTH + k) * h1[j]
        h2.append(jnp.tanh(acc))

    # Layer 3: 5 -> 1
    out = w(_B3_OFF) + w(_W3_OFF + 0) * h2[0]
    for k in range(1, GEN_WIDTH):
        out = out + w(_W3_OFF + k) * h2[k]
    o_ref[...] = out.astype(o_ref.dtype)


def pack_params(params):
    """One-time packing of the 6 Linear tensors into a flat f32[46] scalar table."""
    w1, b1, w2, b2, w3, b3 = params
    return jnp.concatenate(
        [
            w1.reshape(-1),  # [1,5] -> w1_j
            b1.reshape(-1),  # [5]
            w2.reshape(-1),  # [5,5] row-major: index j*5 + k (in j, out k)
            b2.reshape(-1),  # [5]
            w3.reshape(-1),  # [5,1] -> w3_k
            b3.reshape(-1),  # [1]
        ]
    ).astype(jnp.float32)


def default_compute_dtype():
    """bf16 on chips with native bf16 VPU/EUP (v6e, v7x); f32 otherwise (v5e & older)."""
    try:
        kind = jax.devices()[0].device_kind.lower()
    except Exception:
        return jnp.float32
    if ("v6" in kind) or ("v7" in kind) or ("7x" in kind):
        return jnp.bfloat16
    return jnp.float32


def gen_forward(z, packed_params, compute_dtype=jnp.float32):
    """z: [B, NUM_DIM_Z] f32 -> [B, NUM_DIM_X] f32 (matches Gen.forward)."""
    B = z.shape[0]
    z_flat = jnp.asarray(z, jnp.float32).reshape(-1)  # [B] (NUM_DIM_Z == 1)

    # Batch lives on the (sublane, lane) axes of a (rows, 128) f32 slab.
    rows_min = -(-B // LANE)
    if B % LANE == 0 and rows_min >= SUBLANE:
        # Fast path: the slab view is a free reshape — no pad / slice HBM copies.
        rows = rows_min
        z_slab = z_flat.reshape(rows, LANE)
    else:
        # Unaligned batch: pad only up to the next 8x128 row group (<= 1023 elems).
        rows = _round_up(max(rows_min, SUBLANE), SUBLANE)
        z_slab = jnp.pad(z_flat, (0, rows * LANE - B)).reshape(rows, LANE)

    # Big tiles amortize the ~0.35us per-grid-step overhead; splitting into >=2
    # steps whenever possible lets ("parallel",) shard across v7x's two TCs.
    if rows > SUBLANE:
        tile_rows = min(MAX_TILE_ROWS, _round_up(-(-rows // 2), SUBLANE))
    else:
        tile_rows = SUBLANE
    num_tiles = -(-rows // tile_rows)  # ragged last block: OOB reads padded, writes masked

    n_elems = rows * LANE
    out = pl.pallas_call(
        functools.partial(_gen_kernel, compute_dtype=compute_dtype),
        out_shape=jax.ShapeDtypeStruct((rows, LANE), jnp.float32),
        grid=(num_tiles,),
        in_specs=[
            # 46 scalar weights, resident in SMEM for the whole grid.
            pl.BlockSpec(memory_space=pltpu.MemorySpace.SMEM),
            pl.BlockSpec((tile_rows, LANE), lambda i: (i, 0)),
        ],
        out_specs=pl.BlockSpec((tile_rows, LANE), lambda i: (i, 0)),
        compiler_params=pltpu.CompilerParams(
            dimension_semantics=("parallel",),
        ),
        cost_estimate=pl.CostEstimate(
            flops=_FLOPS_PER_ELEM * n_elems,
            transcendentals=_TRANS_PER_ELEM * n_elems,
            bytes_accessed=_BYTES_PER_ELEM * n_elems,
        ),
    )(packed_params, z_slab)

    if rows * LANE == B:
        return out.reshape(B, NUM_DIM_X)  # free reshape, no copy
    # Padded tail samples carry bias-derived garbage; slice them off.
    return out.reshape(-1)[:B].reshape(B, NUM_DIM_X)


gen_forward_jit = jax.jit(gen_forward, static_argnames=("compute_dtype",))


def init_params(key):
    """Deterministic init mimicking torch.nn.Linear default (U(-1/sqrt(fan_in), +))."""

    def linear(k, fan_in, fan_out):
        kw, kb = jax.random.split(k)
        bound = 1.0 / (fan_in ** 0.5)
        # Store weights as [in, out] so forward is x @ W (== x @ W_torch.T).
        w = jax.random.uniform(kw, (fan_in, fan_out), jnp.float32, -bound, bound)
        b = jax.random.uniform(kb, (fan_out,), jnp.float32, -bound, bound)
        return w, b

    k1, k2, k3 = jax.random.split(key, 3)
    w1, b1 = linear(k1, NUM_DIM_Z, GEN_WIDTH)
    w2, b2 = linear(k2, GEN_WIDTH, GEN_WIDTH)
    w3, b3 = linear(k3, GEN_WIDTH, NUM_DIM_X)
    return (w1, b1, w2, b2, w3, b3)


def reference_forward(z, params):
    w1, b1, w2, b2, w3, b3 = params
    h = jnp.tanh(z @ w1 + b1)
    h = jnp.tanh(h @ w2 + b2)
    return h @ w3 + b3


if __name__ == "__main__":
    key = jax.random.PRNGKey(0)
    k_z, k_p = jax.random.split(key)

    params = init_params(k_p)
    packed = pack_params(params)  # one-time packing, hoisted out of the forward path

    cdt = default_compute_dtype()
    # bf16 tanh chains carry ~1% relative error vs the f32 reference; coarse
    # functional tolerance there, tight tolerance on the f32 path.
    if cdt == jnp.float32:
        tol = dict(atol=1e-5, rtol=1e-5)
    else:
        tol = dict(atol=1e-1, rtol=1e-1)

    # (a) the reference script's batch (unaligned -> padded-tail path),
    # (b) a lane-aligned batch exercising the zero-copy fast path + ragged last block.
    for batch in (100, 1152):
        kb = jax.random.fold_in(k_z, batch)
        # z = 10 * (rand(batch, numDimZ) - 0.5), as in the reference script
        z = 10.0 * (jax.random.uniform(kb, (batch, NUM_DIM_Z), jnp.float32) - 0.5)

        out = jax.block_until_ready(gen_forward_jit(z, packed, compute_dtype=cdt))
        ref = reference_forward(z, params)

        assert out.shape == (batch, NUM_DIM_X)
        assert jnp.allclose(out, ref, **tol), f"mismatch vs reference at batch={batch}"

    print("KERNEL_OK")
</pallas_src>

<mosaic_0001>
module attributes {stable_mosaic.version = 11 : i64} {
  func.func @_gen_kernel(%arg0: i32, %arg1: memref<46xf32, #tpu.memory_space<smem>>, %arg2: memref<8x128xf32, #tpu.memory_space<vmem>>, %arg3: memref<8x128xf32, #tpu.memory_space<vmem>>) attributes {dimension_semantics = [#tpu.dimension_semantics<parallel>], iteration_bounds = array<i64: 1>, scalar_prefetch = 0 : i64, scratch_operands = 0 : i64, tpu.core_type = #tpu.core_type<tc>, window_params = [{transform_indices = @transform_0, window_bounds = array<i64: 46>}, {transform_indices = @transform_1, window_bounds = array<i64: 8, 128>}, {transform_indices = @transform_2, window_bounds = array<i64: 8, 128>}]} {
    %c0 = arith.constant 0 : index
    %c0_0 = arith.constant 0 : index
    %0 = vector.load %arg2[%c0, %c0_0] : memref<8x128xf32, #tpu.memory_space<vmem>>, vector<8x128xf32>
    %c0_1 = arith.constant 0 : index
    %1 = memref.load %arg1[%c0_1] : memref<46xf32, #tpu.memory_space<smem>>
    %2 = vector.broadcast %1 : f32 to vector<8x128xf32>
    %3 = arith.mulf %2, %0 : vector<8x128xf32>
    %c5 = arith.constant 5 : index
    %4 = memref.load %arg1[%c5] : memref<46xf32, #tpu.memory_space<smem>>
    %5 = vector.broadcast %4 : f32 to vector<8x128xf32>
    %6 = arith.addf %3, %5 : vector<8x128xf32>
    %7 = math.tanh %6 : vector<8x128xf32>
    %c1 = arith.constant 1 : index
    %8 = memref.load %arg1[%c1] : memref<46xf32, #tpu.memory_space<smem>>
    %9 = vector.broadcast %8 : f32 to vector<8x128xf32>
    %10 = arith.mulf %9, %0 : vector<8x128xf32>
    %c6 = arith.constant 6 : index
    %11 = memref.load %arg1[%c6] : memref<46xf32, #tpu.memory_space<smem>>
    %12 = vector.broadcast %11 : f32 to vector<8x128xf32>
    %13 = arith.addf %10, %12 : vector<8x128xf32>
    %14 = math.tanh %13 : vector<8x128xf32>
    %c2 = arith.constant 2 : index
    %15 = memref.load %arg1[%c2] : memref<46xf32, #tpu.memory_space<smem>>
    %16 = vector.broadcast %15 : f32 to vector<8x128xf32>
    %17 = arith.mulf %16, %0 : vector<8x128xf32>
    %c7 = arith.constant 7 : index
    %18 = memref.load %arg1[%c7] : memref<46xf32, #tpu.memory_space<smem>>
    %19 = vector.broadcast %18 : f32 to vector<8x128xf32>
    %20 = arith.addf %17, %19 : vector<8x128xf32>
    %21 = math.tanh %20 : vector<8x128xf32>
    %c3 = arith.constant 3 : index
    %22 = memref.load %arg1[%c3] : memref<46xf32, #tpu.memory_space<smem>>
    %23 = vector.broadcast %22 : f32 to vector<8x128xf32>
    %24 = arith.mulf %23, %0 : vector<8x128xf32>
    %c8 = arith.constant 8 : index
    %25 = memref.load %arg1[%c8] : memref<46xf32, #tpu.memory_space<smem>>
    %26 = vector.broadcast %25 : f32 to vector<8x128xf32>
    %27 = arith.addf %24, %26 : vector<8x128xf32>
    %28 = math.tanh %27 : vector<8x128xf32>
    %c4 = arith.constant 4 : index
    %29 = memref.load %arg1[%c4] : memref<46xf32, #tpu.memory_space<smem>>
    %30 = vector.broadcast %29 : f32 to vector<8x128xf32>
    %31 = arith.mulf %30, %0 : vector<8x128xf32>
    %c9 = arith.constant 9 : index
    %32 = memref.load %arg1[%c9] : memref<46xf32, #tpu.memory_space<smem>>
    %33 = vector.broadcast %32 : f32 to vector<8x128xf32>
    %34 = arith.addf %31, %33 : vector<8x128xf32>
    %35 = math.tanh %34 : vector<8x128xf32>
    %c35 = arith.constant 35 : index
    %36 = memref.load %arg1[%c35] : memref<46xf32, #tpu.memory_space<smem>>
    %37 = vector.broadcast %36 : f32 to vector<8x128xf32>
    %c10 = arith.constant 10 : index
    %38 = memref.load %arg1[%c10] : memref<46xf32, #tpu.memory_space<smem>>
    %39 = vector.broadcast %38 : f32 to vector<8x128xf32>
    %40 = arith.mulf %39, %7 : vector<8x128xf32>
    %41 = arith.addf %37, %40 : vector<8x128xf32>
    %c15 = arith.constant 15 : index
    %42 = memref.load %arg1[%c15] : memref<46xf32, #tpu.memory_space<smem>>
    %43 = vector.broadcast %42 : f32 to vector<8x128xf32>
    %44 = arith.mulf %43, %14 : vector<8x128xf32>
    %45 = arith.addf %41, %44 : vector<8x128xf32>
    %c20 = arith.constant 20 : index
    %46 = memref.load %arg1[%c20] : memref<46xf32, #tpu.memory_space<smem>>
    %47 = vector.broadcast %46 : f32 to vector<8x128xf32>
    %48 = arith.mulf %47, %21 : vector<8x128xf32>
    %49 = arith.addf %45, %48 : vector<8x128xf32>
    %c25 = arith.constant 25 : index
    %50 = memref.load %arg1[%c25] : memref<46xf32, #tpu.memory_space<smem>>
    %51 = vector.broadcast %50 : f32 to vector<8x128xf32>
    %52 = arith.mulf %51, %28 : vector<8x128xf32>
    %53 = arith.addf %49, %52 : vector<8x128xf32>
    %c30 = arith.constant 30 : index
    %54 = memref.load %arg1[%c30] : memref<46xf32, #tpu.memory_space<smem>>
    %55 = vector.broadcast %54 : f32 to vector<8x128xf32>
    %56 = arith.mulf %55, %35 : vector<8x128xf32>
    %57 = arith.addf %53, %56 : vector<8x128xf32>
    %58 = math.tanh %57 : vector<8x128xf32>
    %c36 = arith.constant 36 : index
    %59 = memref.load %arg1[%c36] : memref<46xf32, #tpu.memory_space<smem>>
    %60 = vector.broadcast %59 : f32 to vector<8x128xf32>
    %c11 = arith.constant 11 : index
    %61 = memref.load %arg1[%c11] : memref<46xf32, #tpu.memory_space<smem>>
    %62 = vector.broadcast %61 : f32 to vector<8x128xf32>
    %63 = arith.mulf %62, %7 : vector<8x128xf32>
    %64 = arith.addf %60, %63 : vector<8x128xf32>
    %c16 = arith.constant 16 : index
    %65 = memref.load %arg1[%c16] : memref<46xf32, #tpu.memory_space<smem>>
    %66 = vector.broadcast %65 : f32 to vector<8x128xf32>
    %67 = arith.mulf %66, %14 : vector<8x128xf32>
    %68 = arith.addf %64, %67 : vector<8x128xf32>
    %c21 = arith.constant 21 : index
    %69 = memref.load %arg1[%c21] : memref<46xf32, #tpu.memory_space<smem>>
    %70 = vector.broadcast %69 : f32 to vector<8x128xf32>
    %71 = arith.mulf %70, %21 : vector<8x128xf32>
    %72 = arith.addf %68, %71 : vector<8x128xf32>
    %c26 = arith.constant 26 : index
    %73 = memref.load %arg1[%c26] : memref<46xf32, #tpu.memory_space<smem>>
    %74 = vector.broadcast %73 : f32 to vector<8x128xf32>
    %75 = arith.mulf %74, %28 : vector<8x128xf32>
    %76 = arith.addf %72, %75 : vector<8x128xf32>
    %c31 = arith.constant 31 : index
    %77 = memref.load %arg1[%c31] : memref<46xf32, #tpu.memory_space<smem>>
    %78 = vector.broadcast %77 : f32 to vector<8x128xf32>
    %79 = arith.mulf %78, %35 : vector<8x128xf32>
    %80 = arith.addf %76, %79 : vector<8x128xf32>
    %81 = math.tanh %80 : vector<8x128xf32>
    %c37 = arith.constant 37 : index
    %82 = memref.load %arg1[%c37] : memref<46xf32, #tpu.memory_space<smem>>
    %83 = vector.broadcast %82 : f32 to vector<8x128xf32>
    %c12 = arith.constant 12 : index
    %84 = memref.load %arg1[%c12] : memref<46xf32, #tpu.memory_space<smem>>
    %85 = vector.broadcast %84 : f32 to vector<8x128xf32>
    %86 = arith.mulf %85, %7 : vector<8x128xf32>
    %87 = arith.addf %83, %86 : vector<8x128xf32>
    %c17 = arith.constant 17 : index
    %88 = memref.load %arg1[%c17] : memref<46xf32, #tpu.memory_space<smem>>
    %89 = vector.broadcast %88 : f32 to vector<8x128xf32>
    %90 = arith.mulf %89, %14 : vector<8x128xf32>
    %91 = arith.addf %87, %90 : vector<8x128xf32>
    %c22 = arith.constant 22 : index
    %92 = memref.load %arg1[%c22] : memref<46xf32, #tpu.memory_space<smem>>
    %93 = vector.broadcast %92 : f32 to vector<8x128xf32>
    %94 = arith.mulf %93, %21 : vector<8x128xf32>
    %95 = arith.addf %91, %94 : vector<8x128xf32>
    %c27 = arith.constant 27 : index
    %96 = memref.load %arg1[%c27] : memref<46xf32, #tpu.memory_space<smem>>
    %97 = vector.broadcast %96 : f32 to vector<8x128xf32>
    %98 = arith.mulf %97, %28 : vector<8x128xf32>
    %99 = arith.addf %95, %98 : vector<8x128xf32>
    %c32 = arith.constant 32 : index
    %100 = memref.load %arg1[%c32] : memref<46xf32, #tpu.memory_space<smem>>
    %101 = vector.broadcast %100 : f32 to vector<8x128xf32>
    %102 = arith.mulf %101, %35 : vector<8x128xf32>
    %103 = arith.addf %99, %102 : vector<8x128xf32>
    %104 = math.tanh %103 : vector<8x128xf32>
    %c38 = arith.constant 38 : index
    %105 = memref.load %arg1[%c38] : memref<46xf32, #tpu.memory_space<smem>>
    %106 = vector.broadcast %105 : f32 to vector<8x128xf32>
    %c13 = arith.constant 13 : index
    %107 = memref.load %arg1[%c13] : memref<46xf32, #tpu.memory_space<smem>>
    %108 = vector.broadcast %107 : f32 to vector<8x128xf32>
    %109 = arith.mulf %108, %7 : vector<8x128xf32>
    %110 = arith.addf %106, %109 : vector<8x128xf32>
    %c18 = arith.constant 18 : index
    %111 = memref.load %arg1[%c18] : memref<46xf32, #tpu.memory_space<smem>>
    %112 = vector.broadcast %111 : f32 to vector<8x128xf32>
    %113 = arith.mulf %112, %14 : vector<8x128xf32>
    %114 = arith.addf %110, %113 : vector<8x128xf32>
    %c23 = arith.constant 23 : index
    %115 = memref.load %arg1[%c23] : memref<46xf32, #tpu.memory_space<smem>>
    %116 = vector.broadcast %115 : f32 to vector<8x128xf32>
    %117 = arith.mulf %116, %21 : vector<8x128xf32>
    %118 = arith.addf %114, %117 : vector<8x128xf32>
    %c28 = arith.constant 28 : index
    %119 = memref.load %arg1[%c28] : memref<46xf32, #tpu.memory_space<smem>>
    %120 = vector.broadcast %119 : f32 to vector<8x128xf32>
    %121 = arith.mulf %120, %28 : vector<8x128xf32>
    %122 = arith.addf %118, %121 : vector<8x128xf32>
    %c33 = arith.constant 33 : index
    %123 = memref.load %arg1[%c33] : memref<46xf32, #tpu.memory_space<smem>>
    %124 = vector.broadcast %123 : f32 to vector<8x128xf32>
    %125 = arith.mulf %124, %35 : vector<8x128xf32>
    %126 = arith.addf %122, %125 : vector<8x128xf32>
    %127 = math.tanh %126 : vector<8x128xf32>
    %c39 = arith.constant 39 : index
    %128 = memref.load %arg1[%c39] : memref<46xf32, #tpu.memory_space<smem>>
    %129 = vector.broadcast %128 : f32 to vector<8x128xf32>
    %c14 = arith.constant 14 : index
    %130 = memref.load %arg1[%c14] : memref<46xf32, #tpu.memory_space<smem>>
    %131 = vector.broadcast %130 : f32 to vector<8x128xf32>
    %132 = arith.mulf %131, %7 : vector<8x128xf32>
    %133 = arith.addf %129, %132 : vector<8x128xf32>
    %c19 = arith.constant 19 : index
    %134 = memref.load %arg1[%c19] : memref<46xf32, #tpu.memory_space<smem>>
    %135 = vector.broadcast %134 : f32 to vector<8x128xf32>
    %136 = arith.mulf %135, %14 : vector<8x128xf32>
    %137 = arith.addf %133, %136 : vector<8x128xf32>
    %c24 = arith.constant 24 : index
    %138 = memref.load %arg1[%c24] : memref<46xf32, #tpu.memory_space<smem>>
    %139 = vector.broadcast %138 : f32 to vector<8x128xf32>
    %140 = arith.mulf %139, %21 : vector<8x128xf32>
    %141 = arith.addf %137, %140 : vector<8x128xf32>
    %c29 = arith.constant 29 : index
    %142 = memref.load %arg1[%c29] : memref<46xf32, #tpu.memory_space<smem>>
    %143 = vector.broadcast %142 : f32 to vector<8x128xf32>
    %144 = arith.mulf %143, %28 : vector<8x128xf32>
    %145 = arith.addf %141, %144 : vector<8x128xf32>
    %c34 = arith.constant 34 : index
    %146 = memref.load %arg1[%c34] : memref<46xf32, #tpu.memory_space<smem>>
    %147 = vector.broadcast %146 : f32 to vector<8x128xf32>
    %148 = arith.mulf %147, %35 : vector<8x128xf32>
    %149 = arith.addf %145, %148 : vector<8x128xf32>
    %150 = math.tanh %149 : vector<8x128xf32>
    %c45 = arith.constant 45 : index
    %151 = memref.load %arg1[%c45] : memref<46xf32, #tpu.memory_space<smem>>
    %152 = vector.broadcast %151 : f32 to vector<8x128xf32>
    %c40 = arith.constant 40 : index
    %153 = memref.load %arg1[%c40] : memref<46xf32, #tpu.memory_space<smem>>
    %154 = vector.broadcast %153 : f32 to vector<8x128xf32>
    %155 = arith.mulf %154, %58 : vector<8x128xf32>
    %156 = arith.addf %152, %155 : vector<8x128xf32>
    %c41 = arith.constant 41 : index
    %157 = memref.load %arg1[%c41] : memref<46xf32, #tpu.memory_space<smem>>
    %158 = vector.broadcast %157 : f32 to vector<8x128xf32>
    %159 = arith.mulf %158, %81 : vector<8x128xf32>
    %160 = arith.addf %156, %159 : vector<8x128xf32>
    %c42 = arith.constant 42 : index
    %161 = memref.load %arg1[%c42] : memref<46xf32, #tpu.memory_space<smem>>
    %162 = vector.broadcast %161 : f32 to vector<8x128xf32>
    %163 = arith.mulf %162, %104 : vector<8x128xf32>
    %164 = arith.addf %160, %163 : vector<8x128xf32>
    %c43 = arith.constant 43 : index
    %165 = memref.load %arg1[%c43] : memref<46xf32, #tpu.memory_space<smem>>
    %166 = vector.broadcast %165 : f32 to vector<8x128xf32>
    %167 = arith.mulf %166, %127 : vector<8x128xf32>
    %168 = arith.addf %164, %167 : vector<8x128xf32>
    %c44 = arith.constant 44 : index
    %169 = memref.load %arg1[%c44] : memref<46xf32, #tpu.memory_space<smem>>
    %170 = vector.broadcast %169 : f32 to vector<8x128xf32>
    %171 = arith.mulf %170, %150 : vector<8x128xf32>
    %172 = arith.addf %168, %171 : vector<8x128xf32>
    %c0_2 = arith.constant 0 : index
    %c0_3 = arith.constant 0 : index
    %173 = vector.load %arg3[%c0_2, %c0_3] : memref<8x128xf32, #tpu.memory_space<vmem>>, vector<8x128xf32>
    tpu.vector_store %arg3[%c0_2, %c0_3], %172 {strides = array<i32>} : memref<8x128xf32, #tpu.memory_space<vmem>>, vector<8x128xf32>,
    return
  }
  func.func @transform_0(%arg0: i32) -> i32 {
    %c0_i32 = arith.constant 0 : i32
    %c0_i32_0 = arith.constant 0 : i32
    return %c0_i32 : i32
  }
  func.func @transform_1(%arg0: i32) -> (i32, i32) {
    %c0_i32 = arith.constant 0 : i32
    %c0_i32_0 = arith.constant 0 : i32
    return %arg0, %c0_i32 : i32, i32
  }
  func.func @transform_2(%arg0: i32) -> (i32, i32) {
    %c0_i32 = arith.constant 0 : i32
    %c0_i32_0 = arith.constant 0 : i32
    return %arg0, %c0_i32 : i32, i32
  }
}

</mosaic_0001>

<bundles_post_ra>
// kernel: gen_forward.1
= control target key start
LH: loop header
LB: loop body
LE: loop exit
PB: predicated region body
PF: predicated region fallthrough
CT: control target
= control target key end

     0   :  { %7 = vsyncpa [#allocation3], 0  ;;  %s409_s0 = inlined_call_operand.vmem [shape: f32[46], index: 0, kind: input, shape index: {}]   ;;  %s410_s1 = inlined_call_operand.vmem [shape: f32[8,128], index: 1, kind: input, shape index: {}]   ;;  %s411_s2 = inlined_call_operand.vmem [shape: f32[8,128], index: 2, kind: output, shape index: {}]  }
   0x1   :  { %s14_s11 = sshll.u32 %s409_s0, 4  ;;  %s15_s11 = int_to_ptr.vmem [resolvable:$true] %s14_s11 }
   0x2   :  { %s269_s12 = scalar_lea.vmem %s15_s11, 16  ;;  %p274_p1 = scmp.lt.s32.totalorder %s15_s11, %s15_s11 }
   0x3   :  { %p270_p0 = scmp.ne.s32.totalorder %s15_s11, %s269_s12  ;;  %p275_p2 = scmp.lt.s32.totalorder %s269_s12, %s269_s12 }
   0x5   :  { %p276_p3 = por %p275_p2, %p274_p1 }
   0x7   :  { %p277_p4 = pnand %p276_p3, %p270_p0 }
   0x9   :  { %280 = shalt.err (!%p277_p4)
}
   0xa   :  { %s283_s13 = smov [#allocation2]  }
   0xb   :  { %17 = dma.vmem_to_smem %s15_s11, 16, %s283_s13, [#allocation3]  }
   0xc   :  { %281 = dma.done.wait [#allocation3], 16  }
   0xd   :  { %282 = vsyncadd [#allocation3], 4294967280 }
   0xe   :  { %23 = sfence }
   0xf   :  { %s25_s14 = sld [smem:[#allocation2]]  ;;  %v24_v0 = vld [vmem:[%s410_s1] sm:$0xff] }
  0x10   :  { %s203_s15 = sld [smem:[#allocation2 + $0x5]] }
  0x11   :  { %s204_s16 = sld [smem:[#allocation2 + $0x1]] }
  0x12   :  { %s205_s17 = sld [smem:[#allocation2 + $0x6]] }
  0x13   :  { %s206_s0 = sld [smem:[#allocation2 + $0x2]] }
  0x14   :  { %s207_s20 = sld [smem:[#allocation2 + $0x7]] }
  0x15   :  { %v26_v1 = vstv %s25_s14  ;;  %s208_s21 = sld [smem:[#allocation2 + $0x3]] }
  0x16   :  { %v27_v2 = vmul.f32 %v26_v1, %v24_v0  ;;  %v29_v3 = vstv %s203_s15  ;;  %s209_s22 = sld [smem:[#allocation2 + $0x8]] }
  0x17   :  { %v33_v4 = vstv %s204_s16  ;;  %s210_s23 = sld [smem:[#allocation2 + $0x4]] }
  0x18   :  { %v30_v5 = vadd.f32 %v29_v3, %v27_v2  ;;  %v34_v6 = vmul.f32 %v33_v4, %v24_v0  ;;  %v36_v7 = vstv %s205_s17  ;;  %s211_s24 = sld [smem:[#allocation2 + $0x9]] }
  0x19   :  { %v40_v8 = vstv %s206_s0  ;;  %s305_s25 = sld [smem:[#allocation2 + $0x23]] }
  0x1a   :  { %249 = vtanh.f32 %v30_v5  ;;  %v37_v9 = vadd.f32 %v36_v7, %v34_v6  ;;  %v41_v10 = vmul.f32 %v40_v8, %v24_v0  ;;  %v43_v11 = vstv %s207_s20  ;;  %s307_s1 = sld [smem:[#allocation2 + $0xa]] }
  0x1b   :  { %v47_v12 = vstv %s208_s21  ;;  %s309_s26 = sld [smem:[#allocation2 + $0xf]] }
  0x1c   :  { %251 = vtanh.f32 %v37_v9  ;;  %v44_v13 = vadd.f32 %v43_v11, %v41_v10  ;;  %v48_v14 = vmul.f32 %v47_v12, %v24_v0  ;;  %v50_v15 = vstv %s209_s22  ;;  %s311_s27 = sld [smem:[#allocation2 + $0x14]] }
  0x1d   :  { %v54_v16 = vstv %s210_s23  ;;  %s313_s28 = sld [smem:[#allocation2 + $0x19]] }
  0x1e   :  { %253 = vtanh.f32 %v44_v13  ;;  %v51_v17 = vadd.f32 %v50_v15, %v48_v14  ;;  %v55_v18 = vmul.f32 %v54_v16, %v24_v0  ;;  %v57_v19 = vstv %s211_s24  ;;  %s315_s29 = sld [smem:[#allocation2 + $0x1e]] }
  0x1f   :  { %s218_s30 = sld [smem:[#allocation2 + $0x24]]  ;;  %v61_v24 = vstv %s305_s25 }
  0x20   :  { %255 = vtanh.f32 %v51_v17  ;;  %v58_v20 = vadd.f32 %v57_v19, %v55_v18  ;;  %s219_s3 = sld [smem:[#allocation2 + $0xb]]  ;;  %v63_v21 = vstv %s307_s1 }
  0x21   :  { %s220_s4 = sld [smem:[#allocation2 + $0x10]]  ;;  %v67_v25 = vstv %s309_s26 }
  0x22   :  { %257 = vtanh.f32 %v58_v20  ;;  %s317_s5 = sld [smem:[#allocation2 + $0x15]]  ;;  %v71_v31 = vstv %s311_s27 }
  0x23   :  { %s319_s6 = sld [smem:[#allocation2 + $0x1a]]  ;;  %v75_v38 = vstv %s313_s28 }
  0x24   :  { %s321_s7 = sld [smem:[#allocation2 + $0x1f]]  ;;  %v79_v39 = vstv %s315_s29 }
  0x25   :  { %s324_s8 = sld [smem:[#allocation2 + $0x25]]  ;;  %v84_v26 = vstv %s218_s30 }
  0x26   :  { %v86_v22 = vstv %s219_s3  ;;  %s326_s9 = sld [smem:[#allocation2 + $0xc]] }
  0x27   :  { %v328_v23 = vpop.eup %249  ;;  %v90_v27 = vstv %s220_s4  ;;  %s332_s10 = sld [smem:[#allocation2 + $0x11]] }
  0x28   :  { %v64_v28 = vmul.f32 %v328_v23, %v63_v21  ;;  %v87_v29 = vmul.f32 %v328_v23, %v86_v22  ;;  %s336_s11 = sld [smem:[#allocation2 + $0x16]]  ;;  %v94_v32 = vstv %s317_s5 }
  0x29   :  { %v338_v30 = vpop.eup %251  ;;  %s342_s12 = sld [smem:[#allocation2 + $0x1b]]  ;;  %v98_v40 = vstv %s319_s6 }
  0x2a   :  { %v65_v33 = vadd.f32 %v64_v28, %v61_v24  ;;  %v68_v34 = vmul.f32 %v338_v30, %v67_v25  ;;  %v88_v35 = vadd.f32 %v87_v29, %v84_v26  ;;  %v91_v36 = vmul.f32 %v338_v30, %v90_v27  ;;  %s346_s13 = sld [smem:[#allocation2 + $0x20]] }
  0x2b   :  { %v348_v37 = vpop.eup %253  ;;  %s353_s14 = sld [smem:[#allocation2 + $0x26]]  ;;  %v102_v46 = vstv %s321_s7  ;;  %v107_v47 = vstv %s324_s8 }
  0x2c   :  { %v69_v41 = vadd.f32 %v68_v34, %v65_v33  ;;  %v72_v42 = vmul.f32 %v348_v37, %v71_v31  ;;  %v92_v43 = vadd.f32 %v91_v36, %v88_v35  ;;  %v95_v44 = vmul.f32 %v348_v37, %v94_v32  ;;  %s357_s15 = sld [smem:[#allocation2 + $0xd]] }
  0x2d   :  { %v359_v45 = vpop.eup %255  ;;  %v109_v48 = vstv %s326_s9  ;;  %v113_v49 = vstv %s332_s10  ;;  %s365_s16 = sld [smem:[#allocation2 + $0x12]] }
  0x2e   :  { %v73_v50 = vadd.f32 %v72_v42, %v69_v41  ;;  %v76_v51 = vmul.f32 %v359_v45, %v75_v38  ;;  %v96_v52 = vadd.f32 %v95_v44, %v92_v43  ;;  %v99_v53 = vmul.f32 %v359_v45, %v98_v40  ;;  %s369_s17 = sld [smem:[#allocation2 + $0x17]] }
  0x2f   :  { %v371_v54 = vpop.eup %257  ;;  %v110_v55 = vmul.f32 %v328_v23, %v109_v48  ;;  %v114_v56 = vmul.f32 %v338_v30, %v113_v49  ;;  %v117_v57 = vstv %s336_s11  ;;  %v121_v58 = vstv %s342_s12  ;;  %s377_s18 = sld [smem:[#allocation2 + $0x1c]] }
  0x30   :  { %v77_v59 = vadd.f32 %v76_v51, %v73_v50  ;;  %v80_v60 = vmul.f32 %v371_v54, %v79_v39  ;;  %v100_v61 = vadd.f32 %v99_v53, %v96_v52  ;;  %v103_v62 = vmul.f32 %v371_v54, %v102_v46  ;;  %s381_s19 = sld [smem:[#allocation2 + $0x21]] }
  0x31   :  { %v111_v63 = vadd.f32 %v110_v55, %v107_v47  ;;  %v118_v0 = vmul.f32 %v348_v37, %v117_v57  ;;  %s384_s0 = sld [smem:[#allocation2 + $0x27]]  ;;  %v122_v3 = vmul.f32 %v359_v45, %v121_v58  ;;  %v125_v4 = vstv %s346_s13 }
  0x32   :  { %v81_v1 = vadd.f32 %v80_v60, %v77_v59  ;;  %v104_v2 = vadd.f32 %v103_v62, %v100_v61  ;;  %s237_s20 = sld [smem:[#allocation2 + $0xe]]  ;;  %v130_v6 = vstv %s353_s14  ;;  %v132_v7 = vstv %s357_s15 }
  0x33   :  { %v115_v5 = vadd.f32 %v114_v56, %v111_v63  ;;  %v136_v8 = vstv %s365_s16  ;;  %s238_s21 = sld [smem:[#allocation2 + $0x13]]  ;;  %v133_v9 = vmul.f32 %v328_v23, %v132_v7  ;;  %v126_v13 = vmul.f32 %v371_v54, %v125_v4 }
  0x34   :  { %259 = vtanh.f32 %v81_v1  ;;  %v137_v10 = vmul.f32 %v338_v30, %v136_v8  ;;  %v140_v11 = vstv %s369_s17  ;;  %s239_s22 = sld [smem:[#allocation2 + $0x18]] }
  0x35   :  { %261 = vtanh.f32 %v104_v2  ;;  %v119_v12 = vadd.f32 %v118_v0, %v115_v5  ;;  %v144_v14 = vstv %s377_s18  ;;  %s240_s23 = sld [smem:[#allocation2 + $0x1d]]  ;;  %v134_v15 = vadd.f32 %v133_v9, %v130_v6 }
  0x36   :  { %v141_v16 = vmul.f32 %v348_v37, %v140_v11  ;;  %s241_s24 = sld [smem:[#allocation2 + $0x22]]  ;;  %v148_v18 = vstv %s381_s19  ;;  %v145_v20 = vmul.f32 %v359_v45, %v144_v14 }
  0x37   :  { %v123_v17 = vadd.f32 %v122_v3, %v119_v12  ;;  %v138_v19 = vadd.f32 %v137_v10, %v134_v15  ;;  %v153_v21 = vstv %s384_s0  ;;  %s243_s25 = sld [smem:[#allocation2 + $0x28]]  ;;  %v149_v28 = vmul.f32 %v371_v54, %v148_v18 }
  0x38   :  { %v155_v22 = vstv %s237_s20  ;;  %s242_s1 = sld [smem:[#allocation2 + $0x2d]] }
  0x39   :  { %v127_v24 = vadd.f32 %v126_v13, %v123_v17  ;;  %v156_v25 = vmul.f32 %v328_v23, %v155_v22  ;;  %v159_v26 = vstv %s238_s21  ;;  %v142_v27 = vadd.f32 %v141_v16, %v138_v19  ;;  %s244_s26 = sld [smem:[#allocation2 + $0x29]] }
  0x3a   :  { %v160_v29 = vmul.f32 %v338_v30, %v159_v26  ;;  %v163_v31 = vstv %s239_s22  ;;  %s245_s27 = sld [smem:[#allocation2 + $0x2a]] }
  0x3b   :  { %263 = vtanh.f32 %v127_v24  ;;  %v157_v32 = vadd.f32 %v156_v25, %v153_v21  ;;  %v164_v33 = vmul.f32 %v348_v37, %v163_v31  ;;  %v167_v34 = vstv %s240_s23  ;;  %s246_s28 = sld [smem:[#allocation2 + $0x2b]] }
  0x3c   :  { %v146_v35 = vadd.f32 %v145_v20, %v142_v27  ;;  %v171_v36 = vstv %s241_s24  ;;  %v168_v39 = vmul.f32 %v359_v45, %v167_v34  ;;  %s247_s29 = sld [smem:[#allocation2 + $0x2c]] }
  0x3d   :  { %v161_v38 = vadd.f32 %v160_v29, %v157_v32  ;;  %v172_v41 = vmul.f32 %v371_v54, %v171_v36  ;;  %v178_v42 = vstv %s243_s25 }
  0x3e   :  { %v150_v23 = vadd.f32 %v149_v28, %v146_v35  ;;  %v176_v46 = vstv %s242_s1 }
  0x3f   :  { %v165_v40 = vadd.f32 %v164_v33, %v161_v38  ;;  %v182_v48 = vstv %s244_s26 }
  0x40   :  { %265 = vtanh.f32 %v150_v23  ;;  %v186_v51 = vstv %s245_s27 }
  0x41   :  { %v260_v30 = vpop.eup %259  ;;  %v169_v43 = vadd.f32 %v168_v39, %v165_v40  ;;  %v190_v55 = vstv %s246_s28 }
  0x42   :  { %v262_v44 = vpop.eup %261  ;;  %v179_v47 = vmul.f32 %v260_v30, %v178_v42  ;;  %v194_v58 = vstv %s247_s29 }
  0x43   :  { %v173_v37 = vadd.f32 %v172_v41, %v169_v43  ;;  %v183_v50 = vmul.f32 %v262_v44, %v182_v48 }
  0x44   :  { %v180_v49 = vadd.f32 %v179_v47, %v176_v46 }
  0x45   :  { %267 = vtanh.f32 %v173_v37 }
  0x46   :  { %v184_v52 = vadd.f32 %v183_v50, %v180_v49 }
  0x48   :  { %v264_v45 = vpop.eup %263 }
  0x49   :  { %v187_v53 = vmul.f32 %v264_v45, %v186_v51 }
  0x4b   :  { %v188_v56 = vadd.f32 %v187_v53, %v184_v52 }
  0x4d   :  { %v266_v54 = vpop.eup %265 }
  0x4e   :  { %v191_v57 = vmul.f32 %v266_v54, %v190_v55 }
  0x50   :  { %v192_v59 = vadd.f32 %v191_v57, %v188_v56 }
  0x52   :  { %v268_v60 = vpop.eup %267 }
  0x53   :  { %v195_v61 = vmul.f32 %v268_v60, %v194_v58 }
  0x55   :  { %v196_v62 = vadd.f32 %v195_v61, %v192_v59 }
  0x57   :  { %197 = vst [vmem:[%s411_s2] sm:$0xff] %v196_v62 }
  0x58   :  { %202 = vsyncpa [#allocation3], 1 }

</bundles_post_ra>
